<compile_context>
chip_gen: v7x
topology: tpu7x:2x2x1
jax: 0.10.0
libtpu: 0.0.40
codegen_flags: <defaults>
</compile_context>

<pallas_src>
import functools

import jax
import jax.numpy as jnp
from jax.experimental import pallas as pl
from jax.experimental.pallas import tpu as pltpu


# ----------------------------------------------------------------------------
# Pallas kernel: tiled Linear forward  y = x @ W + b
# ----------------------------------------------------------------------------
def _linear_kernel(x_ref, w_ref, b_ref, o_ref, acc_ref):
    k = pl.program_id(2)

    @pl.when(k == 0)
    def _init():
        acc_ref[...] = jnp.zeros_like(acc_ref)

    # bf16 x bf16 -> f32 accumulate on the MXU.
    acc_ref[...] += jnp.dot(
        x_ref[...], w_ref[...], preferred_element_type=jnp.float32
    )

    @pl.when(k == pl.num_programs(2) - 1)
    def _finalize():
        # Bias add hoisted out of the K loop: one VPU pass per output tile.
        o_ref[...] = (acc_ref[...] + b_ref[...].astype(jnp.float32)).astype(
            o_ref.dtype
        )


def _round_up(x, m):
    return ((x + m - 1) // m) * m


def pallas_linear(x, w, b):
    """x: (M, K), w: (K, N), b: (1, N)  ->  (M, N) f32.

    Operands are cast to bf16 for the MXU; accumulation is f32.
    Ragged shapes are zero-padded to lane/sublane-aligned tiles and the
    result is sliced back.
    """
    M, K = x.shape
    K2, N = w.shape
    assert K == K2 and b.shape == (1, N)

    xb = x.astype(jnp.bfloat16)
    wb = w.astype(jnp.bfloat16)
    bf = b.astype(jnp.float32)

    # Tile selection: sublane-aligned M tile, lane-aligned N/K tiles,
    # capped at the 256-wide MXU-native size (tk capped at 512).
    tm = min(_round_up(M, 8), 256)
    tn = min(_round_up(N, 128), 256)
    tk = min(_round_up(K, 128), 512)

    Mp = _round_up(M, tm)
    Np = _round_up(N, tn)
    Kp = _round_up(K, tk)

    if (Mp, Kp) != (M, K):
        xb = jnp.pad(xb, ((0, Mp - M), (0, Kp - K)))
    if (Kp, Np) != (K, N):
        wb = jnp.pad(wb, ((0, Kp - K), (0, Np - N)))
    if Np != N:
        bf = jnp.pad(bf, ((0, 0), (0, Np - N)))

    grid = (Mp // tm, Np // tn, Kp // tk)

    cost = pl.CostEstimate(
        flops=2 * Mp * Np * Kp,
        transcendentals=0,
        bytes_accessed=2 * (Mp * Kp + Kp * Np) + 4 * (Mp * Np + Np),
    )

    out = pl.pallas_call(
        _linear_kernel,
        out_shape=jax.ShapeDtypeStruct((Mp, Np), jnp.float32),
        grid_spec=pltpu.PrefetchScalarGridSpec(
            num_scalar_prefetch=0,
            grid=grid,
            in_specs=[
                pl.BlockSpec((tm, tk), lambda i, j, k: (i, k)),
                pl.BlockSpec((tk, tn), lambda i, j, k: (k, j)),
                pl.BlockSpec((1, tn), lambda i, j, k: (0, j)),
            ],
            out_specs=pl.BlockSpec((tm, tn), lambda i, j, k: (i, j)),
            scratch_shapes=[pltpu.VMEM((tm, tn), jnp.float32)],
        ),
        compiler_params=pltpu.CompilerParams(
            # M/N parallel (sharded across the 2 TCs on v7x), K reduction.
            dimension_semantics=("parallel", "parallel", "arbitrary"),
            vmem_limit_bytes=32 * 1024 * 1024,
        ),
        cost_estimate=cost,
    )(xb, wb, bf)

    if (Mp, Np) != (M, N):
        out = out[:M, :N]
    return out


# Below this many MACs the pallas_call launch / per-step overhead dominates;
# XLA's fused matmul is faster for such tiny layers.
_PALLAS_MIN_MACS = 1 << 18


def _linear_apply(x, w, b, *, force_pallas):
    M, K = x.shape
    _, N = w.shape
    if force_pallas or (M * K * N >= _PALLAS_MIN_MACS):
        return pallas_linear(x, w, b)
    # Tiny-problem bypass: plain XLA matmul (still bf16 operands, f32 accum).
    return (
        jnp.dot(
            x.astype(jnp.bfloat16),
            w.astype(jnp.bfloat16),
            preferred_element_type=jnp.float32,
        )
        + b.astype(jnp.float32)
    )


# ----------------------------------------------------------------------------
# Sub-model stored in the registrar (its forward is the Pallas kernel above).
# ----------------------------------------------------------------------------
class PallasLinear:
    def __init__(self, key, in_features, out_features, *, force_pallas=True):
        kw, kb = jax.random.split(key)
        # Weights stored in bf16 (MXU-native, halves weight DMA); bias in f32.
        # Shapes: weight (in, out) == PyTorch weight (out, in) transposed.
        # TODO(synk): PyTorch nn.Linear uses Kaiming-uniform init; synthetic
        # normal init kept here for the demo.
        self.weight = (
            jax.random.normal(kw, (in_features, out_features), jnp.float32) * 0.02
        ).astype(jnp.bfloat16)
        self.bias = jax.random.normal(kb, (1, out_features), jnp.float32) * 0.02
        self.device = None
        self._fwd = jax.jit(
            functools.partial(_linear_apply, force_pallas=force_pallas)
        )

    def parameters(self):
        return [self.weight, self.bias]

    def to(self, device):
        self.weight = jax.device_put(self.weight, device)
        self.bias = jax.device_put(self.bias, device)
        self.device = device
        return self

    def __call__(self, x):
        return self._fwd(x, self.weight, self.bias)


def get_model_device(model):
    # JAX analogue of `next(model.parameters()).device`
    return list(model.parameters()[0].devices())[0]


# ----------------------------------------------------------------------------
# ModelRegistrar — same API / semantics as the PyTorch module.
# ----------------------------------------------------------------------------
class ModelRegistrar:
    def __init__(self, model_dir, device):
        self.model_dict = {}
        self.model_dir = model_dir
        self.device = device

    def forward(self):
        # Exact PyTorch semantics: the registrar itself has no forward compute.
        raise NotImplementedError(
            "Although ModelRegistrar is a nn.Module, it is only to store parameters."
        )

    def get_model(self, name, model_if_absent=None):
        if name in self.model_dict:
            return self.model_dict[name]
        elif model_if_absent is not None:
            # PyTorch picks cuda-if-available; here: default JAX device (TPU).
            self.device = jax.devices()[0]
            self.model_dict[name] = model_if_absent.to(self.device)
            return self.model_dict[name]
        else:
            raise ValueError(f"{name} was never initialized in this Registrar!")

    def get_name_match(self, name):
        return [m for k, m in self.model_dict.items() if name in k]

    def get_all_but_name_match(self, name):
        return [m for k, m in self.model_dict.items() if name not in k]

    def print_model_names(self):
        print(list(self.model_dict.keys()))

    # TODO(synk): save_models / load_models are host-side torch.save/torch.load
    # serialization; no Pallas equivalent — kept as dict passthrough.
    def save_models(self, save_path):
        pass

    def load_models(self, model_dict):
        self.model_dict.clear()
        print("Loading Encoder")
        self.model_dict = model_dict

    def to(self, device):
        for name, model in self.model_dict.items():
            if get_model_device(model) != device:
                model.to(device)


# ----------------------------------------------------------------------------
# Demo
# ----------------------------------------------------------------------------
if __name__ == "__main__":
    key = jax.random.PRNGKey(0)
    k_model, k_x = jax.random.split(key)

    # Small but lane/sublane-aligned shapes; K=1024 > tk=512 so the kernel's
    # K-reduction loop (init / accumulate / bias-finalize) is exercised.
    M, K, N = 16, 1024, 128

    registrar = ModelRegistrar(model_dir="/tmp/unused", device=None)

    # Registrar.forward() must raise, exactly like the PyTorch module.
    try:
        registrar.forward()
        raise AssertionError("ModelRegistrar.forward() should have raised")
    except NotImplementedError:
        pass

    # Register a sub-model (this is where the stored parameters live).
    linear = registrar.get_model(
        "policy_net/node_encoder", PallasLinear(k_model, K, N, force_pallas=True)
    )
    assert registrar.get_model("policy_net/node_encoder") is linear
    assert len(registrar.get_name_match("policy_net")) == 1
    assert len(registrar.get_all_but_name_match("policy_net")) == 0

    # Run the registered model's forward through the Pallas kernel.
    x = jax.random.normal(k_x, (M, K), jnp.float32)
    y = jax.block_until_ready(linear(x))
    assert y.shape == (M, N)

    # Correctness: compare against a bf16-operand / f32-accumulate reference
    # (same numerics path), and loosely against a full-f32 reference.
    w_bf = linear.weight.astype(jnp.bfloat16)
    y_ref_bf16 = (
        jnp.dot(x.astype(jnp.bfloat16), w_bf, preferred_element_type=jnp.float32)
        + linear.bias
    )
    y_ref_f32 = x @ linear.weight.astype(jnp.float32) + linear.bias
    assert jnp.allclose(y, y_ref_bf16, atol=1e-3, rtol=1e-3)
    assert jnp.allclose(y, y_ref_f32, atol=5e-2, rtol=5e-2)

    print("KERNEL_OK")
</pallas_src>

<mosaic_0001>
module attributes {stable_mosaic.version = 11 : i64} {
  func.func @_linear_kernel(%arg0: i32, %arg1: i32, %arg2: i32, %arg3: memref<16x512xbf16, #tpu.memory_space<vmem>>, %arg4: memref<512x128xbf16, #tpu.memory_space<vmem>>, %arg5: memref<1x128xf32, #tpu.memory_space<vmem>>, %arg6: memref<16x128xf32, #tpu.memory_space<vmem>>, %arg7: memref<16x128xf32, #tpu.memory_space<vmem>>) attributes {dimension_semantics = [#tpu.dimension_semantics<parallel>, #tpu.dimension_semantics<parallel>, #tpu.dimension_semantics<arbitrary>], iteration_bounds = array<i64: 1, 1, 2>, scalar_prefetch = 0 : i64, scratch_operands = 1 : i64, tpu.core_type = #tpu.core_type<tc>, window_params = [{transform_indices = @transform_0, window_bounds = array<i64: 16, 512>}, {transform_indices = @transform_1, window_bounds = array<i64: 512, 128>}, {transform_indices = @transform_2, window_bounds = array<i64: 1, 128>}, {transform_indices = @transform_3, window_bounds = array<i64: 16, 128>}]} {
    %c0_i32 = arith.constant 0 : i32
    %0 = arith.cmpi eq, %arg2, %c0_i32 : i32
    %1 = arith.extui %0 : i1 to i32
    %c0_i32_0 = arith.constant 0 : i32
    %2 = arith.cmpi ne, %1, %c0_i32_0 : i32
    scf.if %2 {
      %cst_9 = arith.constant 0.000000e+00 : f32
      %12 = vector.broadcast %cst_9 : f32 to vector<16x128xf32>
      %c0_10 = arith.constant 0 : index
      %c0_11 = arith.constant 0 : index
      %13 = vector.load %arg7[%c0_10, %c0_11] : memref<16x128xf32, #tpu.memory_space<vmem>>, vector<16x128xf32>
      tpu.vector_store %arg7[%c0_10, %c0_11], %12 {strides = array<i32>} : memref<16x128xf32, #tpu.memory_space<vmem>>, vector<16x128xf32>,
    } else {
    }
    %c0 = arith.constant 0 : index
    %c0_1 = arith.constant 0 : index
    %3 = vector.load %arg7[%c0, %c0_1] : memref<16x128xf32, #tpu.memory_space<vmem>>, vector<16x128xf32>
    %c0_2 = arith.constant 0 : index
    %c0_3 = arith.constant 0 : index
    %4 = vector.load %arg3[%c0_2, %c0_3] : memref<16x512xbf16, #tpu.memory_space<vmem>>, vector<16x512xbf16>
    %c0_4 = arith.constant 0 : index
    %c0_5 = arith.constant 0 : index
    %5 = vector.load %arg4[%c0_4, %c0_5] : memref<512x128xbf16, #tpu.memory_space<vmem>>, vector<512x128xbf16>
    %cst = arith.constant dense<0.000000e+00> : vector<16x128xf32>
    %6 = tpu.matmul %4, %5, %cst {dimension_numbers = #tpu.dot_dimension_numbers<[1], [0], [0], [1], [0, 0, 1, 1], [], []>} : vector<16x512xbf16>, vector<512x128xbf16>, vector<16x128xf32> -> vector<16x128xf32>
    %7 = arith.addf %3, %6 : vector<16x128xf32>
    %c0_6 = arith.constant 0 : index
    %c0_7 = arith.constant 0 : index
    %8 = vector.load %arg7[%c0_6, %c0_7] : memref<16x128xf32, #tpu.memory_space<vmem>>, vector<16x128xf32>
    tpu.vector_store %arg7[%c0_6, %c0_7], %7 {strides = array<i32>} : memref<16x128xf32, #tpu.memory_space<vmem>>, vector<16x128xf32>,
    %c1_i32 = arith.constant 1 : i32
    %9 = arith.cmpi eq, %arg2, %c1_i32 : i32
    %10 = arith.extui %9 : i1 to i32
    %c0_i32_8 = arith.constant 0 : i32
    %11 = arith.cmpi ne, %10, %c0_i32_8 : i32
    scf.if %11 {
      %c0_9 = arith.constant 0 : index
      %c0_10 = arith.constant 0 : index
      %12 = vector.load %arg7[%c0_9, %c0_10] : memref<16x128xf32, #tpu.memory_space<vmem>>, vector<16x128xf32>
      %c0_11 = arith.constant 0 : index
      %c0_12 = arith.constant 0 : index
      %13 = vector.load %arg5[%c0_11, %c0_12] : memref<1x128xf32, #tpu.memory_space<vmem>>, vector<1x128xf32>
      %14 = vector.broadcast %13 : vector<1x128xf32> to vector<16x128xf32>
      %15 = arith.addf %12, %14 : vector<16x128xf32>
      %c0_13 = arith.constant 0 : index
      %c0_14 = arith.constant 0 : index
      %16 = vector.load %arg6[%c0_13, %c0_14] : memref<16x128xf32, #tpu.memory_space<vmem>>, vector<16x128xf32>
      tpu.vector_store %arg6[%c0_13, %c0_14], %15 {strides = array<i32>} : memref<16x128xf32, #tpu.memory_space<vmem>>, vector<16x128xf32>,
    } else {
    }
    return
  }
  func.func @transform_0(%arg0: i32, %arg1: i32, %arg2: i32) -> (i32, i32) {
    %c0_i32 = arith.constant 0 : i32
    return %arg0, %arg2 : i32, i32
  }
  func.func @transform_1(%arg0: i32, %arg1: i32, %arg2: i32) -> (i32, i32) {
    %c0_i32 = arith.constant 0 : i32
    return %arg2, %arg1 : i32, i32
  }
  func.func @transform_2(%arg0: i32, %arg1: i32, %arg2: i32) -> (i32, i32) {
    %c0_i32 = arith.constant 0 : i32
    %c0_i32_0 = arith.constant 0 : i32
    return %c0_i32, %arg1 : i32, i32
  }
  func.func @transform_3(%arg0: i32, %arg1: i32, %arg2: i32) -> (i32, i32) {
    %c0_i32 = arith.constant 0 : i32
    return %arg0, %arg1 : i32, i32
  }
}

</mosaic_0001>

<bundles_post_ra>
// kernel: _linear_apply.1
= control target key start
LH: loop header
LB: loop body
LE: loop exit
PB: predicated region body
PF: predicated region fallthrough
CT: control target
= control target key end

     0   :  { %8 = vsyncpa [#allocation5], 0  ;;  %s1311_s0 = inlined_call_operand.vmem [shape: bf16[16,1024], index: 0, kind: input, shape index: {}]   ;;  %s1312_s1 = inlined_call_operand.hbm [shape: bf16[1024,128], index: 1, kind: input, shape index: {}]   ;;  %s1313_s2 = inlined_call_operand.vmem [shape: f32[1,128], index: 2, kind: input, shape index: {}]   ;;  %s1314_s3 = inlined_call_operand.hbm [shape: f32[16,128], index: 3, kind: output, shape index: {}]  }
   0x1   :  { %10 = vsyncpa [#allocation5 + $0x1], 0 }
   0x2   :  { %11 = vsyncpa [#allocation6], 0  ;;  %s1120_s12 = smov 0   ;;  %s1122_s13 = smov 0  }
   0x3   :  { %s1124_s14 = smov 0   ;;  %s1126_s15 = smov 0  }
   0x4   :  { %s1128_s16 = smov 0   ;;  %s1130_s17 = smov 0  }
   0x5 LB: > { %s781_s18 = sadd.s32 4294967295, %s1091_s17   ;;  %s29_s19 = sadd.s32 1, %s1087_s16  ;;  %s1091_s17 = sphi %s1130_s17, %s17_s17   ;;  %s1087_s16 = sphi %s1128_s16, %s1322_s16   ;;  %s1083_s15 = sphi %s1126_s15, %s1321_s15   ;;  %s1079_s14 = sphi %s1124_s14, %s1320_s14   ;;  %s1075_s13 = sphi %s1122_s13, %s1319_s13   ;;  %s1071_s12 = sphi %s1120_s12, %s1318_s12  }
   0x6   : > { %p30_p0 = scmp.ge.s32.totalorder %s29_s19, 2  ;;  %s45_s20 = sadd.s32 1, %s1079_s14 }
   0x7   : > { %p52_p1 = scmp.ne.s32.totalorder %s1079_s14, %s1075_s13  ;;  %p53_p2 = scmp.eq.s32.totalorder %s1091_s17, 0 }
   0x8   : > { %s1324_s19 = smov (%p30_p0, %s29_s19), 0  ;;  %p86_p4 = scmp.ne.s32.totalorder %s1075_s13, %s1071_s12 }
   0x9   : > { %p1156_p3 = por %p53_p2, %p52_p1  ;;  %s41_s22 = ssub.s32 %s1087_s16, %s1324_s19 }
   0xa   : > { %p87_p5 = scmp.eq.s32.totalorder %s781_s18, 0  ;;  %p43_p6 = scmp.eq.s32.totalorder %s41_s22, 0 }
   0xb   : > { %p784_p8 = scmp.ge.s32.totalorder %s1091_s17, 2 }
   0xc   : > { %p1165_p7 = por %p87_p5, %p86_p4 }
   0xd   : > { %s1170_s24 = scalar_select %p43_p6, %s1079_s14, %s45_s20  }
   0xe   : > { %166 = sbr.rel (%p784_p8) target bundleno = 54 (0x36), region = 20 }
  0x15   : > { %169 = sbr.rel (!%p1156_p3) target bundleno = 28 (0x1c), region = 24  ;;  %s171_s25 = sand.u32 (%p1156_p3), 1, %s1079_s14  }
  0x16   : > { %s837_s26 = sshll.u32 (%p1156_p3), %s1087_s16, 4  ;;  %s785_s27 = sshll.u32 (%p1156_p3), %s171_s25, 5 }
  0x17   : > { %s179_s30 = scalar_lea.vmem (%p1156_p3), %s1311_s0, %s837_s26  ;;  %s173_s4 = scalar_lea.vmem (%p1156_p3), [#allocation3], %s785_s27 }
  0x18   : > { %v192_v0 = vld [vmem:[%s179_s30] sm:$0xff] (%p1156_p3)  ;;  %v194_v1 = vld [vmem:[%s179_s30 + $0x8] sm:$0xff] (%p1156_p3) }
  0x19   : > { %v196_v2 = vld [vmem:[%s179_s30 + $0x20] sm:$0xff] (%p1156_p3)  ;;  %193 = vst [vmem:[%s173_s4] sm:$0xff] (%p1156_p3), %v192_v0  ;;  %195 = vst [vmem:[%s173_s4 + $0x8] sm:$0xff] (%p1156_p3), %v194_v1  ;;  %v198_v3 = vld [vmem:[%s179_s30 + $0x28] sm:$0xff] (%p1156_p3) }
  0x1a   : > { %197 = vst [vmem:[%s173_s4 + $0x10] sm:$0xff] (%p1156_p3), %v196_v2  ;;  %199 = vst [vmem:[%s173_s4 + $0x18] sm:$0xff] (%p1156_p3), %v198_v3 }
  0x1c PF: > { %s206_s5 = sand.u32 1, %s1079_s14   ;;  %s838_s6 = sshll.u32 %s1087_s16, 12 }
  0x1d   : > { %s788_s7 = sshll.u32 %s206_s5, 8  ;;  %s1185_s10 = scalar_lea.hbm %s1312_s1, %s838_s6 }
  0x1e   : > { %s210_s11 = scalar_lea.vmem [#allocation4], %s788_s7  ;;  %s1189_s20 = scalar_lea.sflag [#allocation5], %s206_s5 }
  0x1f   : > { %s218_s12 = sshll.u32 %s210_s11, 4  ;;  %s983_s22 = scalar_lea.hbm %s1185_s10, 4096  ;;  %s1187_s12 = int_to_ptr.vmem [resolvable:$true] %s218_s12 }
  0x20   : > { %p984_p9 = scmp.ne.s32.totalorder %s1185_s10, %s983_s22  ;;  %s987_s27 = scalar_lea.hbm %s1312_s1, 8192 }
  0x21   : > { %p988_p12 = scmp.lt.u32.totalorder %s1185_s10, %s1312_s1  ;;  %p989_p13 = scmp.lt.u32.totalorder %s987_s27, %s983_s22 }
  0x22   : > { %p985_p10 = pnand %p984_p9, %p1156_p3  ;;  %p991_p1 = scmp.lt.u32.totalorder %s983_s22, %s1185_s10 }
  0x23   : > { %p990_p0 = por %p989_p13, %p988_p12 }
  0x24   : > { %p986_p11 = pneg %p985_p10 }
  0x25   : > { %p992_p2 = por %p991_p1, %p990_p0 }
  0x27   : > { %p993_p4 = pnand %p992_p2, %p986_p11 }
  0x29   : > { %996 = shalt.err (!%p993_p4)
}
  0x2a   : > { %s997_s30 = scalar_lea.vmem %s1187_s12, 4096  ;;  %s1093_s4 = smov [#allocation4]  }
  0x2b   : > { %p998_p5 = scmp.ne.s32.totalorder %s1187_s12, %s997_s30  ;;  %s1001_s5 = sshll.u32 %s1093_s4, 4  ;;  %s1002_s5 = int_to_ptr.vmem [resolvable:$false] %s1001_s5 }
  0x2c   : > { %s1003_s6 = scalar_lea.vmem %s1002_s5, 8192  ;;  %p1004_p9 = scmp.lt.s32.totalorder %s1187_s12, %s1002_s5 }
  0x2d   : > { %p999_p6 = pnand %p998_p5, %p1156_p3  ;;  %p1005_p10 = scmp.lt.s32.totalorder %s1003_s6, %s997_s30 }
  0x2f   : > { %p1000_p8 = pneg %p999_p6  ;;  %p1006_p12 = por %p1005_p10, %p1004_p9 }
  0x31   : > { %p1007_p13 = pnand %p1006_p12, %p1000_p8 }
  0x33   : > { %1010 = shalt.err (!%p1007_p13)
}
  0x34   : > { %s1094_s7 = smov 64   ;;  %s1095_s8 = smov 4  }
  0x35   : > { %883 = dma.hbm_to_vmem [thread:$0]  (%p1156_p3), %s1185_s10, 4096, %s1187_s12, %s1189_s20, %s1094_s7, %s1094_s7, %s1095_s8  }
  0x36 PF: > { %p791_p11 = scmp.ge.s32.totalorder %s1091_s17, 1  ;;  %p226_p0 = scmp.lt.s32.totalorder %s1091_s17, 3 }
  0x38   : > { %p227_p1 = pnand %p791_p11, %p226_p0 }
  0x39   : > { %s233_s9 = sand.u32 (!%p227_p1), 1, %s1075_s13  }
  0x3a   : > { %230 = sbr.rel (%p227_p1) target bundleno = 368 (0x170), region = 51  ;;  %s792_s11 = sshll.u32 (!%p227_p1), %s233_s9, 5 }
  0x3b   : > { %s793_s22 = sshll.u32 (!%p227_p1), %s233_s9, 8  ;;  %s1216_s25 = scalar_lea.vmem (!%p227_p1), [#allocation3], %s792_s11 }
  0x3c   : > { %s240_s26 = scalar_lea.sflag (!%p227_p1), [#allocation5], %s233_s9  ;;  %s1218_s27 = scalar_lea.vmem (!%p227_p1), [#allocation4], %s793_s22 }
  0x41   : > { %1062 = dma.done.wait (%p1165_p7), %s240_s26, 4096  }
  0x42   : > { %1064 = vsyncadd (%p1165_p7), %s240_s26, 4294963200  ;;  %p794_p3 = scmp.ne.s32.totalorder %s1083_s15, 0 }
  0x43   : > { %v1096_v4 = vmov (!%p794_p3), 0.0  }
  0x44   : > { %279 = sbr.rel (%p794_p3) target bundleno = 75 (0x4b), region = 63  ;;  %280 = vst [vmem:[#allocation2] sm:$0xff] (!%p794_p3), %v1096_v4  ;;  %281 = vst [vmem:[#allocation2 + $0x8] sm:$0xff] (!%p794_p3), %v1096_v4 }
  0x4b PF: > { %v945_v5 = vld [vmem:[%s1218_s27 + $0x40] sm:$0xff]   ;;  %v949_v9 = vld [vmem:[%s1218_s27 + $0x48] sm:$0xff]   ;;  %v953_v13 = vld [vmem:[%s1218_s27 + $0x50] sm:$0xff]   ;;  %p831_p7 = scmp.ne.s32.totalorder %s1083_s15, 1 }
  0x4c   : > { %v946_v6 = vld [vmem:[%s1218_s27 + $0xc0] sm:$0xff]   ;;  %839 = vmatprep.subr.bf16.mxu0 %v945_v5  ;;  %v950_v10 = vld [vmem:[%s1218_s27 + $0xc8] sm:$0xff]   ;;  %v954_v14 = vld [vmem:[%s1218_s27 + $0xd0] sm:$0xff]  }
  0x4d   : > { %v947_v7 = vld [vmem:[%s1218_s27] sm:$0xff]   ;;  %861 = vmatprep.subr.bf16.mxu1 %v946_v6  ;;  %v951_v11 = vld [vmem:[%s1218_s27 + $0x8] sm:$0xff]   ;;  %v955_v15 = vld [vmem:[%s1218_s27 + $0x10] sm:$0xff]  }
  0x4e   : > { %v948_v8 = vld [vmem:[%s1218_s27 + $0x80] sm:$0xff]   ;;  %840 = vmatpush3.bf16.msra.mxu0 %v947_v7  ;;  %v952_v12 = vld [vmem:[%s1218_s27 + $0x88] sm:$0xff]   ;;  %v956_v16 = vld [vmem:[%s1218_s27 + $0x90] sm:$0xff]  }
  0x4f   : > { %862 = vmatpush3.bf16.msra.mxu1 %v948_v8  ;;  %841 = vmatprep.subr.bf16.mxu0 %v949_v9  ;;  %v957_v17 = vld [vmem:[%s1218_s27 + $0x58] sm:$0xff]   ;;  %v961_v21 = vld [vmem:[%s1218_s27 + $0x60] sm:$0xff]   ;;  %v965_v25 = vld [vmem:[%s1218_s27 + $0x68] sm:$0xff]  }
  0x50   : > { %863 = vmatprep.subr.bf16.mxu1 %v950_v10  ;;  %v958_v18 = vld [vmem:[%s1218_s27 + $0xd8] sm:$0xff]   ;;  %v962_v22 = vld [vmem:[%s1218_s27 + $0xe0] sm:$0xff]   ;;  %v966_v26 = vld [vmem:[%s1218_s27 + $0xe8] sm:$0xff]  }
  0x51   : > { %v959_v19 = vld [vmem:[%s1218_s27 + $0x18] sm:$0xff]   ;;  %v963_v23 = vld [vmem:[%s1218_s27 + $0x20] sm:$0xff]   ;;  %v967_v27 = vld [vmem:[%s1218_s27 + $0x28] sm:$0xff]  }
  0x52   : > { %842 = vmatpush3.bf16.msra.mxu0 %v951_v11  ;;  %v960_v20 = vld [vmem:[%s1218_s27 + $0x98] sm:$0xff]   ;;  %v964_v24 = vld [vmem:[%s1218_s27 + $0xa0] sm:$0xff]   ;;  %v968_v28 = vld [vmem:[%s1218_s27 + $0xa8] sm:$0xff]  }
  0x53   : > { %864 = vmatpush3.bf16.msra.mxu1 %v952_v12  ;;  %843 = vmatprep.subr.bf16.mxu0 %v953_v13  ;;  %v969_v29 = vld [vmem:[%s1218_s27 + $0x70] sm:$0xff]   ;;  %v973_v33 = vld [vmem:[%s1218_s27 + $0x78] sm:$0xff]  }
  0x54   : > { %865 = vmatprep.subr.bf16.mxu1 %v954_v14  ;;  %v970_v30 = vld [vmem:[%s1218_s27 + $0xf0] sm:$0xff]   ;;  %v974_v34 = vld [vmem:[%s1218_s27 + $0xf8] sm:$0xff]  }
  0x55   : > { %v971_v31 = vld [vmem:[%s1218_s27 + $0x30] sm:$0xff]   ;;  %v975_v35 = vld [vmem:[%s1218_s27 + $0x38] sm:$0xff]  }
  0x56   : > { %844 = vmatpush3.bf16.msra.mxu0 %v955_v15  ;;  %v972_v32 = vld [vmem:[%s1218_s27 + $0xb0] sm:$0xff]   ;;  %v976_v36 = vld [vmem:[%s1218_s27 + $0xb8] sm:$0xff]  }
  0x57   : > { %866 = vmatpush3.bf16.msra.mxu1 %v956_v16  ;;  %845 = vmatprep.subr.bf16.mxu0 %v957_v17  ;;  %v977_v37 = vld [vmem:[%s1216_s25] ss:$16 sps:$4 sm:$0xff]   ;;  %v979_v38 = vld [vmem:[%s1216_s25 + $0x4] ss:$16 sps:$4 sm:$0xff]   ;;  %v980_v39 = vld [vmem:[%s1216_s25 + $0x8] ss:$16 sps:$4 sm:$0xff]  }
  0x58   : > { %867 = vmatprep.subr.bf16.mxu1 %v958_v18  ;;  %v982_v40 = vld [vmem:[%s1216_s25 + $0xc] ss:$16 sps:$4 sm:$0xff]   ;;  %596 = vmatprep.mubr.bf16.mxu0 %v979_v38  ;;  %v282_v50 = vld [vmem:[#allocation2] sm:$0xff] }
  0x59   : > { %637 = vmatprep.mubr.bf16.mxu1 %v982_v40  ;;  %v283_v55 = vld [vmem:[#allocation2 + $0x8] sm:$0xff]  ;;  %v832_v60 = vld [vmem:[%s1313_s2] ss:$0 sm:$0xff] (!%p831_p7) }
  0x5a   : > { %846 = vmatpush3.bf16.msra.mxu0 %v959_v19 }
  0x5b   : > { %868 = vmatpush3.bf16.msra.mxu1 %v960_v20  ;;  %847 = vmatprep.subr.bf16.mxu0 %v961_v21 }
  0x5c   : > { %869 = vmatprep.subr.bf16.mxu1 %v962_v22 }
  0x5e   : > { %848 = vmatpush3.bf16.msra.mxu0 %v963_v23 }
  0x5f   : > { %870 = vmatpush3.bf16.msra.mxu1 %v964_v24  ;;  %849 = vmatprep.subr.bf16.mxu0 %v965_v25 }
  0x60   : > { %871 = vmatprep.subr.bf16.mxu1 %v966_v26 }
  0x62   : > { %850 = vmatpush3.bf16.msra.mxu0 %v967_v27 }
  0x63   : > { %872 = vmatpush3.bf16.msra.mxu1 %v968_v28  ;;  %851 = vmatprep.subr.bf16.mxu0 %v969_v29 }
  0x64   : > { %873 = vmatprep.subr.bf16.mxu1 %v970_v30 }
  0x66   : > { %852 = vmatpush3.bf16.msra.mxu0 %v971_v31 }
  0x67   : > { %874 = vmatpush3.bf16.msra.mxu1 %v972_v32  ;;  %853 = vmatprep.subr.bf16.mxu0 %v973_v33 }
  0x68   : > { %875 = vmatprep.subr.bf16.mxu1 %v974_v34 }
  0x6a   : > { %854 = vmatpush3.bf16.msra.mxu0 %v975_v35 }
  0x6b   : > { %876 = vmatpush3.bf16.msra.mxu1 %v976_v36 }
  0x6d   : > { %597 = vmatmul.mubr.bf16.vlgmr.msra.gmra.mrb[0].mxu0 %v977_v37 }
  0x6e   : > { %638 = vmatmul.mubr.bf16.vlgmr.msra.gmra.mrb[0].mxu1 %v980_v39 }
 0x140   : > { %v855_v41 = vpop.f32.mrb[0].mxu0 }
 0x141   : > { %v877_v42 = vpop.f32.mrb[0].mxu1  ;;  %v856_v43 = vpop.f32.mrb[1].mxu0 }
 0x142   : > { %v857_v44 = vadd.f32 %v856_v43, %v855_v41  ;;  %v878_v45 = vpop.f32.mrb[1].mxu1  ;;  %v858_v46 = vpop.f32.mrb[2].mxu0 }
 0x143   : > { %v879_v47 = vadd.f32 %v878_v45, %v877_v42  ;;  %v880_v48 = vpop.f32.mrb[2].mxu1  ;;  %v859_v49 = vpop.f32.mrb[3].mxu0 }
 0x144   : > { %v860_v51 = vadd.f32 %v859_v49, %v858_v46  ;;  %v881_v52 = vpop.f32.mrb[3].mxu1 }
 0x145   : > { %v640_v53 = vadd.f32 %v879_v47, %v857_v44  ;;  %v882_v54 = vadd.f32 %v881_v52, %v880_v48  ;;  %653 = sbr.rel (%p831_p7) target bundleno = 342 (0x156), region = 67 }
 0x147   : > { %v646_v56 = vadd.f32 %v640_v53, %v282_v50  ;;  %v643_v57 = vadd.f32 %v882_v54, %v860_v51 }
 0x149   : > { %648 = vst [vmem:[#allocation2] sm:$0xff] %v646_v56  ;;  %v647_v58 = vadd.f32 %v643_v57, %v283_v55 }
 0x14b   : > { %649 = vst [vmem:[#allocation2 + $0x8] sm:$0xff] %v647_v58 }
 0x150   : > { %v654_v59 = vld [vmem:[#allocation2] sm:$0xff] }
 0x151   : > { %v663_v62 = vadd.f32 %v832_v60, %v654_v59 }
 0x152   : > { %v655_v61 = vld [vmem:[#allocation2 + $0x8] sm:$0xff] }
 0x153   : > { %v664_v63 = vadd.f32 %v832_v60, %v655_v61  ;;  %665 = vst [vmem:[#allocation7] sm:$0xff] %v663_v62 }
 0x155   : > { %666 = vst [vmem:[#allocation7 + $0x8] sm:$0xff] %v664_v63 }
 0x156 PF: > { %p1267_p2 = scmp.eq.s32.totalorder %s781_s18, 1  ;;  %s1097_s15 = smov [#allocation7]  }
 0x157   : > { %s677_s12 = sshll.u32 %s1097_s15, 4  ;;  %s678_s12 = int_to_ptr.vmem [resolvable:$true] %s677_s12 }
 0x158   : > { %s1011_s20 = scalar_lea.vmem %s678_s12, 256  ;;  %p1018_p8 = scmp.lt.s32.totalorder %s678_s12, %s678_s12 }
 0x159   : > { %p1012_p4 = scmp.ne.s32.totalorder %s678_s12, %s1011_s20  ;;  %p1019_p9 = scmp.lt.s32.totalorder %s1011_s20, %s1011_s20 }
 0x15b   : > { %p1013_p5 = pnand %p1012_p4, %p1267_p2  ;;  %p1020_p10 = por %p1019_p9, %p1018_p8 }
 0x15d   : > { %p1014_p6 = pneg %p1013_p5 }
 0x15f   : > { %p1021_p12 = pnand %p1020_p10, %p1014_p6 }
 0x161   : > { %1024 = shalt.err (!%p1021_p12)
}
 0x162   : > { %s1025_s18 = scalar_lea.hbm %s1314_s3, 256 }
 0x163   : > { %p1026_p13 = scmp.ne.s32.totalorder %s1314_s3, %s1025_s18  ;;  %p1031_p1 = scmp.lt.u32.totalorder %s1025_s18, %s1314_s3 }
 0x165   : > { %p1027_p11 = pnand %p1026_p13, %p1267_p2 }
 0x167   : > { %p1028_p0 = pneg %p1027_p11 }
 0x169   : > { %p1033_p3 = pnand %p1031_p1, %p1028_p0 }
 0x16b   : > { %1036 = shalt.err (!%p1033_p3)
}
 0x16c   : > { %s1098_s7 = smov 128   ;;  %s1099_s8 = smov 8  }
 0x16d   : > { %886 = dma.vmem_to_hbm [thread:$0]  (%p1267_p2), %s678_s12, 256, %s1314_s3, [#allocation6], %s1098_s7, %s1098_s7, %s1099_s8  }
 0x16e   : > { %1066 = dma.done.wait (%p1267_p2), [#allocation6], 256  }
 0x16f   : > { %1068 = vsyncadd (%p1267_p2), [#allocation6], 4294967040 }
 0x170 PF: > { %s17_s17 = sadd.s32 1, %s1091_s17   ;;  %s1318_s12 = smov %s1075_s13 }
 0x171   : > { %p14_p7 = scmp.ge.s32.totalorder %s17_s17, 4   ;;  %s1319_s13 = smov %s1079_s14 }
 0x172   : > { %s1320_s14 = smov %s1170_s24  ;;  %s1321_s15 = smov %s1087_s16 }
 0x173   : > { %s1322_s16 = smov %s1324_s19  ;;  %16 = sbr.rel (!%p14_p7) target bundleno = 5 (0x5), region = 112 }
 0x17a   :  { %693 = vsyncpa [#allocation5], 1 }
 0x17b   :  { %695 = vsyncpa [#allocation5 + $0x1], 1 }
 0x17c   :  { %696 = vsyncpa [#allocation6], 1 }
 0x17d   :  { %698 = vsyncpa [#allocation6 + $0x1], 1 }

</bundles_post_ra>
